<compile_context>
chip_gen: v7x
topology: tpu7x:2x2x1
jax: 0.10.0
libtpu: 0.0.40
codegen_flags: <defaults>
</compile_context>

<pallas_src>
import jax
import jax.numpy as jnp
import numpy as np
from jax.experimental import pallas as pl
from jax.experimental.pallas import tpu as pltpu


def _scale_shift_kernel(x_ref, scale_ref, shift_ref, o_ref):
    # x_ref/o_ref: (TR, TL); scale_ref/shift_ref: (1 or TR, TL), broadcast over rows.
    o_ref[...] = (x_ref[...] * scale_ref[...] + shift_ref[...]).astype(o_ref.dtype)


def _round_down(x, m):
    return (x // m) * m


def _round_up(x, m):
    return ((x + m - 1) // m) * m


def _physical_vmem_bytes():
    try:
        return int(pltpu.get_tpu_info().vmem_capacity_bytes)
    except Exception:
        return 64 * 1024 * 1024  # conservative default (v7x)


def scale_shift(x, scale_param, shift_param, *, target_block_bytes=None):
    """x: (N, C, H, W); scale_param/shift_param: (C, H, W). Returns x*scale + shift."""
    N, C, H, W = x.shape
    HW = H * W
    CHW = C * HW
    assert scale_param.shape == (C, H, W)
    assert shift_param.shape == (C, H, W)

    dtype = x.dtype
    itemsize = np.dtype(dtype).itemsize
    pack = max(8, 32 // itemsize)  # sublane packing: f32 -> 8, bf16 -> 16, int8/fp8 -> 32

    phys_vmem = _physical_vmem_bytes()
    vmem_cap = phys_vmem // 2  # leave headroom for Mosaic internals (32 MiB on v7x)
    if target_block_bytes is None:
        # ~4 MiB blocks on v7x (64 MiB VMEM), ~8 MiB on v5e/v6e (128 MiB VMEM).
        target_block_bytes = int(min(16 << 20, max(2 << 20, phys_vmem // 16)))

    # ---- choose the lane-dense 2D view -------------------------------------
    # Fold channels into rows when N is tiny and it is layout-clean: gives full
    # sublane occupancy and a multi-step parallel grid (dual-TC on v7x).
    fold = (N < pack) and (C % pack == 0) and (HW % 128 == 0)

    if fold:
        R, L = N * C, HW
        x2 = x.reshape(R, L)
        scale2 = scale_param.reshape(C, L).astype(dtype)
        shift2 = shift_param.reshape(C, L).astype(dtype)
    else:
        R, L = N, CHW
        x2 = x.reshape(R, L)
        scale2 = scale_param.reshape(1, L).astype(dtype)
        shift2 = shift_param.reshape(1, L).astype(dtype)

    # ---- lane tile: full L if it fits the budget, else a big multiple of 128 ----
    max_lanes = max(128, target_block_bytes // (pack * itemsize))
    if L <= max_lanes:
        tl = L  # "equal full dim" escape of the (8,128) rule
    else:
        tl = max(128, _round_down(max_lanes, 128))
        # NOTE: if L % 128 != 0 the last lane block is ragged (masked stores only
        # on that one block) -- correctness is handled by Pallas masking.

    # ---- row tile, rounded to the dtype's sublane packing -------------------
    rows_fit = max(1, target_block_bytes // (tl * itemsize))
    if fold:
        # Channel-row tile must be a pack-aligned divisor of C so x-row blocks
        # never straddle a batch element (keeps the scale index_map exact).
        tc = pack
        for d in range(pack, C + 1, pack):
            if C % d == 0 and d <= rows_fit:
                tc = d
        tn = tc
        cb = C // tc  # channel blocks per batch element
    else:
        tn = R if rows_fit >= R else max(pack, _round_down(rows_fit, pack))
        cb = 1

    # ---- v7x: make sure both TensorCores get work on medium inputs ----------
    if pl.cdiv(R, tn) * pl.cdiv(L, tl) == 1 and R * L * itemsize >= (1 << 20):
        if (not fold) and R >= 2 * pack:
            tn = min(R, _round_up(pl.cdiv(R, 2), pack))
        elif L >= 256:
            half = _round_up(pl.cdiv(L, 2), 128)
            if half < L:
                tl = half

    grid = (pl.cdiv(R, tn), pl.cdiv(L, tl))

    # ---- BlockSpecs ----------------------------------------------------------
    x_spec = pl.BlockSpec((tn, tl), lambda i, j: (i, j))
    out_spec = pl.BlockSpec((tn, tl), lambda i, j: (i, j))
    if fold:
        param_rows = tn
        param_spec = pl.BlockSpec((tn, tl), lambda i, j: (i % cb, j))
    else:
        param_rows = 1
        param_spec = pl.BlockSpec((1, tl), lambda i, j: (0, j))

    # ---- scoped VMEM: 2x double-buffered x block + out block + params + slack ----
    block_bytes = tn * tl * itemsize
    param_bytes = 2 * 2 * param_rows * tl * itemsize
    vmem_limit_bytes = int(
        min(vmem_cap, max(4 * block_bytes + param_bytes + (1 << 20), 4 << 20))
    )

    out2 = pl.pallas_call(
        _scale_shift_kernel,
        out_shape=jax.ShapeDtypeStruct((R, L), dtype),
        grid=grid,
        in_specs=[x_spec, param_spec, param_spec],
        out_specs=out_spec,
        compiler_params=pltpu.CompilerParams(
            dimension_semantics=("parallel", "parallel"),
            vmem_limit_bytes=vmem_limit_bytes,
        ),
    )(x2, scale2, shift2)

    return out2.reshape(N, C, H, W)


if __name__ == "__main__":
    key = jax.random.PRNGKey(0)

    # Primary case: matches the module spec (batch=2, channels=4, spatial=16).
    N, C, H, W = 2, 4, 16, 16
    x = jax.random.normal(key, (N, C, H, W), dtype=jnp.float32)
    # ScaleShift.__init__: scale_param = ones(shape), shift_param = zeros(shape).
    scale_param = jnp.ones((C, H, W), dtype=jnp.float32)
    shift_param = jnp.zeros((C, H, W), dtype=jnp.float32)
    out = jax.block_until_ready(scale_shift(x, scale_param, shift_param))
    ref = x * scale_param + shift_param
    assert out.shape == x.shape and out.dtype == x.dtype
    assert jnp.allclose(out, ref, atol=1e-6, rtol=1e-6)

    # Non-trivial params + bf16 activations (exercises explicit dtype handling).
    k1, k2, k3 = jax.random.split(key, 3)
    xb = jax.random.normal(k1, (N, C, H, W), dtype=jnp.bfloat16)
    sp = jax.random.normal(k2, (C, H, W), dtype=jnp.float32)
    hp = jax.random.normal(k3, (C, H, W), dtype=jnp.float32)
    outb = jax.block_until_ready(scale_shift(xb, sp, hp))
    refb = xb * sp.astype(jnp.bfloat16) + hp.astype(jnp.bfloat16)
    assert outb.shape == xb.shape and outb.dtype == jnp.bfloat16
    assert jnp.allclose(outb.astype(jnp.float32), refb.astype(jnp.float32),
                        atol=5e-2, rtol=5e-2)

    # Channel-folded path (small N, pack-aligned C) with forced lane tiling.
    N2, C2, H2, W2 = 2, 16, 32, 32
    x3 = jax.random.normal(k1, (N2, C2, H2, W2), dtype=jnp.float32)
    sp3 = jax.random.normal(k2, (C2, H2, W2), dtype=jnp.float32)
    hp3 = jax.random.normal(k3, (C2, H2, W2), dtype=jnp.float32)
    out3 = jax.block_until_ready(
        scale_shift(x3, sp3, hp3, target_block_bytes=16 * 1024))
    ref3 = x3 * sp3 + hp3
    assert jnp.allclose(out3, ref3, atol=1e-6, rtol=1e-6)

    print("KERNEL_OK")
</pallas_src>

<mosaic_0001>
module attributes {stable_mosaic.version = 11 : i64} {
  func.func @_scale_shift_kernel(%arg0: i32, %arg1: i32, %arg2: memref<2x1024xf32, #tpu.memory_space<vmem>>, %arg3: memref<1x1024xf32, #tpu.memory_space<vmem>>, %arg4: memref<1x1024xf32, #tpu.memory_space<vmem>>, %arg5: memref<2x1024xf32, #tpu.memory_space<vmem>>) attributes {dimension_semantics = [#tpu.dimension_semantics<parallel>, #tpu.dimension_semantics<parallel>], iteration_bounds = array<i64: 1, 1>, scalar_prefetch = 0 : i64, scratch_operands = 0 : i64, tpu.core_type = #tpu.core_type<tc>, window_params = [{transform_indices = @transform_0, window_bounds = array<i64: 2, 1024>}, {transform_indices = @transform_1, window_bounds = array<i64: 1, 1024>}, {transform_indices = @transform_2, window_bounds = array<i64: 1, 1024>}, {transform_indices = @transform_3, window_bounds = array<i64: 2, 1024>}]} {
    %c0 = arith.constant 0 : index
    %c0_0 = arith.constant 0 : index
    %0 = vector.load %arg2[%c0, %c0_0] : memref<2x1024xf32, #tpu.memory_space<vmem>>, vector<2x1024xf32>
    %c0_1 = arith.constant 0 : index
    %c0_2 = arith.constant 0 : index
    %1 = vector.load %arg3[%c0_1, %c0_2] : memref<1x1024xf32, #tpu.memory_space<vmem>>, vector<1x1024xf32>
    %2 = vector.broadcast %1 : vector<1x1024xf32> to vector<2x1024xf32>
    %3 = arith.mulf %0, %2 : vector<2x1024xf32>
    %c0_3 = arith.constant 0 : index
    %c0_4 = arith.constant 0 : index
    %4 = vector.load %arg4[%c0_3, %c0_4] : memref<1x1024xf32, #tpu.memory_space<vmem>>, vector<1x1024xf32>
    %5 = vector.broadcast %4 : vector<1x1024xf32> to vector<2x1024xf32>
    %6 = arith.addf %3, %5 : vector<2x1024xf32>
    %c0_5 = arith.constant 0 : index
    %c0_6 = arith.constant 0 : index
    %7 = vector.load %arg5[%c0_5, %c0_6] : memref<2x1024xf32, #tpu.memory_space<vmem>>, vector<2x1024xf32>
    tpu.vector_store %arg5[%c0_5, %c0_6], %6 {strides = array<i32>} : memref<2x1024xf32, #tpu.memory_space<vmem>>, vector<2x1024xf32>,
    return
  }
  func.func @transform_0(%arg0: i32, %arg1: i32) -> (i32, i32) {
    %c0_i32 = arith.constant 0 : i32
    return %arg0, %arg1 : i32, i32
  }
  func.func @transform_1(%arg0: i32, %arg1: i32) -> (i32, i32) {
    %c0_i32 = arith.constant 0 : i32
    %c0_i32_0 = arith.constant 0 : i32
    return %c0_i32, %arg1 : i32, i32
  }
  func.func @transform_2(%arg0: i32, %arg1: i32) -> (i32, i32) {
    %c0_i32 = arith.constant 0 : i32
    %c0_i32_0 = arith.constant 0 : i32
    return %c0_i32, %arg1 : i32, i32
  }
  func.func @transform_3(%arg0: i32, %arg1: i32) -> (i32, i32) {
    %c0_i32 = arith.constant 0 : i32
    return %arg0, %arg1 : i32, i32
  }
}

</mosaic_0001>

<bundles_post_ra>
// kernel: tpu_custom_call.1
= control target key start
LH: loop header
LB: loop body
LE: loop exit
PB: predicated region body
PF: predicated region fallthrough
CT: control target
= control target key end

     0   :  { %8 = vsyncpa [#allocation3], 0  ;;  %s386_s0 = inlined_call_operand.hbm [shape: f32[2,1024], index: 0, kind: input, shape index: {}]   ;;  %s387_s1 = inlined_call_operand.hbm [shape: f32[1,1024], index: 1, kind: input, shape index: {}]   ;;  %s388_s2 = inlined_call_operand.hbm [shape: f32[1,1024], index: 2, kind: input, shape index: {}]   ;;  %s389_s3 = inlined_call_operand.hbm [shape: f32[2,1024], index: 3, kind: output, shape index: {}]  }
   0x1   :  { %9 = vsyncpa [#allocation6], 0 }
   0x2   :  { %10 = vsyncpa [#allocation4], 0  ;;  %s313_s12 = smov [#allocation5]   ;;  %s314_s14 = smov [#allocation2]  }
   0x3   :  { %s27_s13 = sshll.u32 %s313_s12, 4  ;;  %s17_s15 = sshll.u32 %s314_s14, 4  ;;  %s28_s13 = int_to_ptr.vmem [resolvable:$true] %s27_s13  ;;  %s18_s15 = int_to_ptr.vmem [resolvable:$true] %s17_s15 }
   0x4   :  { %s219_s18 = scalar_lea.hbm %s387_s1, 128 }
   0x5   :  { %p220_p0 = scmp.ne.s32.totalorder %s387_s1, %s219_s18  ;;  %p223_p1 = scmp.lt.u32.totalorder %s219_s18, %s387_s1 }
   0x7   :  { %p225_p2 = pnand %p223_p1, %p220_p0 }
   0x9   :  { %228 = shalt.err (!%p225_p2)
}
   0xa   :  { %s229_s23 = scalar_lea.vmem %s28_s13, 128  ;;  %p234_p4 = scmp.lt.s32.totalorder %s28_s13, %s28_s13 }
   0xb   :  { %p230_p3 = scmp.ne.s32.totalorder %s28_s13, %s229_s23  ;;  %p235_p5 = scmp.lt.s32.totalorder %s229_s23, %s229_s23 }
   0xd   :  { %p236_p6 = por %p235_p5, %p234_p4 }
   0xf   :  { %p237_p7 = pnand %p236_p6, %p230_p3 }
  0x11   :  { %240 = shalt.err (!%p237_p7)
}
  0x12   :  { %30 = dma.hbm_to_vmem [thread:$0]  %s387_s1, 128, %s28_s13, [#allocation6]  }
  0x13   :  { %s241_s28 = scalar_lea.hbm %s386_s0, 256 }
  0x14   :  { %p242_p8 = scmp.ne.s32.totalorder %s386_s0, %s241_s28  ;;  %p245_p9 = scmp.lt.u32.totalorder %s241_s28, %s386_s0 }
  0x16   :  { %p247_p10 = pnand %p245_p9, %p242_p8 }
  0x18   :  { %250 = shalt.err (!%p247_p10)
}
  0x19   :  { %s251_s6 = scalar_lea.vmem %s18_s15, 256  ;;  %p256_p12 = scmp.lt.s32.totalorder %s18_s15, %s18_s15 }
  0x1a   :  { %p252_p11 = scmp.ne.s32.totalorder %s18_s15, %s251_s6  ;;  %p257_p13 = scmp.lt.s32.totalorder %s251_s6, %s251_s6 }
  0x1c   :  { %p258_p0 = por %p257_p13, %p256_p12 }
  0x1e   :  { %p259_p1 = pnand %p258_p0, %p252_p11 }
  0x20   :  { %262 = shalt.err (!%p259_p1)
}
  0x21   :  { %20 = dma.hbm_to_vmem [thread:$0]  %s386_s0, 256, %s18_s15, [#allocation3]  }
  0x22   :  { %s315_s8 = smov [#allocation7]   ;;  %s263_s12 = scalar_lea.hbm %s388_s2, 128 }
  0x23   :  { %s37_s9 = sshll.u32 %s315_s8, 4  ;;  %p264_p2 = scmp.ne.s32.totalorder %s388_s2, %s263_s12  ;;  %s38_s9 = int_to_ptr.vmem [resolvable:$true] %s37_s9 }
  0x24   :  { %p267_p3 = scmp.lt.u32.totalorder %s263_s12, %s388_s2 }
  0x26   :  { %p269_p4 = pnand %p267_p3, %p264_p2 }
  0x28   :  { %272 = shalt.err (!%p269_p4)
}
  0x29   :  { %s273_s18 = scalar_lea.vmem %s38_s9, 128  ;;  %p278_p6 = scmp.lt.s32.totalorder %s38_s9, %s38_s9 }
  0x2a   :  { %p274_p5 = scmp.ne.s32.totalorder %s38_s9, %s273_s18  ;;  %p279_p7 = scmp.lt.s32.totalorder %s273_s18, %s273_s18 }
  0x2c   :  { %p280_p8 = por %p279_p7, %p278_p6 }
  0x2e   :  { %p281_p9 = pnand %p280_p8, %p274_p5 }
  0x30   :  { %284 = shalt.err (!%p281_p9)
}
  0x31   :  { %40 = dma.hbm_to_vmem [thread:$0]  %s388_s2, 128, %s38_s9, [#allocation6]  }
  0x32   :  { %307 = dma.done.wait [#allocation3], 256  }
  0x33   :  { %308 = vsyncadd [#allocation3], 4294967040 }
  0x34   :  { %309 = dma.done.wait [#allocation6], 256  }
  0x35   :  { %310 = vsyncadd [#allocation6], 4294967040  ;;  %v54_v0 = vlaneseq  ;;  %v316_v1 = vmov 1983009808   ;;  %v52_v11 = vld [vmem:[#allocation5] sm:$0xff]  ;;  %v124_v13 = vld [vmem:[#allocation7] sm:$0xff] }
  0x36   :  { %v89_v2 = vunpack.c.l.s4 %v316_v1  ;;  %v50_v36 = vld [vmem:[#allocation2] sm:$0xff]  ;;  %v51_v49 = vld [vmem:[#allocation2 + $0x8] sm:$0xff]  ;;  %s317_s2 = smov [#allocation8]  }
  0x37   :  { %v55_v3 = vshrl.u32 %v54_v0, 7  ;;  %s204_s19 = sshll.u32 %s317_s2, 4  ;;  %s205_s19 = int_to_ptr.vmem [resolvable:$true] %s204_s19 }
  0x38   :  { %v90_v4 = vunpack.c.0.s8 %v89_v2  ;;  %s285_s20 = scalar_lea.vmem %s205_s19, 256  ;;  %p290_p11 = scmp.lt.s32.totalorder %s205_s19, %s205_s19 }
  0x39   :  { %v56_v5 = vsub.s32 0, %v55_v3  ;;  %v60_v6 = vsub.s32 1, %v55_v3  ;;  %v64_v7 = vsub.s32 2, %v55_v3  ;;  %v68_v8 = vsub.s32 3, %v55_v3  ;;  %p286_p10 = scmp.ne.s32.totalorder %s205_s19, %s285_s20  ;;  %p291_p12 = scmp.lt.s32.totalorder %s285_s20, %s285_s20 }
  0x3a   :  { %v72_v9 = vsub.s32 4, %v55_v3  ;;  %v76_v10 = vsub.s32 5, %v55_v3  ;;  %v93_v12 = vsub.s32 %v90_v4, %v55_v3  ;;  %v80_v14 = vsub.s32 6, %v55_v3 }
  0x3b   :  { %v84_v15 = vsub.s32 7, %v55_v3  ;;  %v57_v16 = vrot.slane %v52_v11, %v56_v5  ;;  %v61_v17 = vrot.slane %v52_v11, %v60_v6  ;;  %v65_v18 = vrot.slane %v52_v11, %v64_v7  ;;  %p292_p13 = por %p291_p12, %p290_p11 }
  0x3c   :  { %v69_v19 = vrot.slane %v52_v11, %v68_v8  ;;  %v129_v20 = vrot.slane %v124_v13, %v56_v5  ;;  %v133_v21 = vrot.slane %v124_v13, %v60_v6  ;;  %v137_v22 = vrot.slane %v124_v13, %v64_v7 }
  0x3d   :  { %v141_v23 = vrot.slane %v124_v13, %v68_v8  ;;  %v86_v24 = vcombine.low %v57_v16, %v61_v17  ;;  %v73_v26 = vrot.slane %v52_v11, %v72_v9  ;;  %v77_v27 = vrot.slane %v52_v11, %v76_v10  ;;  %p293_p0 = pnand %p292_p13, %p286_p10 }
  0x3e   :  { %v87_v25 = vcombine.low %v65_v18, %v69_v19  ;;  %v158_v28 = vcombine.low %v129_v20, %v133_v21  ;;  %v81_v30 = vrot.slane %v52_v11, %v80_v14  ;;  %v85_v31 = vrot.slane %v52_v11, %v84_v15 }
  0x3f   :  { %v159_v29 = vcombine.low %v137_v22, %v141_v23  ;;  %v94_v32 = vrot.slane %v86_v24, %v93_v12  ;;  %v103_v34 = vcombine.low %v73_v26, %v77_v27  ;;  %v145_v35 = vrot.slane %v124_v13, %v72_v9 }
  0x40   :  { %v101_v33 = vrot.slane %v87_v25, %v93_v12  ;;  %v166_v37 = vrot.slane %v158_v28, %v93_v12  ;;  %v104_v39 = vcombine.low %v81_v30, %v85_v31  ;;  %v149_v40 = vrot.slane %v124_v13, %v76_v10 }
  0x41   :  { %v173_v38 = vrot.slane %v159_v29, %v93_v12  ;;  %v111_v42 = vrot.slane %v103_v34, %v93_v12  ;;  %v153_v43 = vrot.slane %v124_v13, %v80_v14  ;;  %v157_v44 = vrot.slane %v124_v13, %v84_v15 }
  0x42   :  { %v102_v41 = vcombine.low %v94_v32, %v101_v33  ;;  %v118_v46 = vrot.slane %v104_v39, %v93_v12  ;;  %v175_v47 = vcombine.low %v145_v35, %v149_v40 }
  0x43   :  { %v174_v45 = vcombine.low %v166_v37, %v173_v38  ;;  %v176_v50 = vcombine.low %v153_v43, %v157_v44 }
  0x44   :  { %v122_v48 = vmul.f32 %v102_v41, %v50_v36  ;;  %v119_v51 = vcombine.low %v111_v42, %v118_v46  ;;  %v183_v52 = vrot.slane %v175_v47, %v93_v12 }
  0x45   :  { %v190_v54 = vrot.slane %v176_v50, %v93_v12 }
  0x46   :  { %v194_v53 = vadd.f32 %v174_v45, %v122_v48  ;;  %v123_v55 = vmul.f32 %v119_v51, %v51_v49 }
  0x47   :  { %v191_v56 = vcombine.low %v183_v52, %v190_v54 }
  0x48   :  { %196 = vst [vmem:[#allocation8] sm:$0xff] %v194_v53 }
  0x49   :  { %v195_v57 = vadd.f32 %v191_v56, %v123_v55 }
  0x4b   :  { %197 = vst [vmem:[#allocation8 + $0x8] sm:$0xff] %v195_v57 }
  0x4c   :  { %296 = shalt.err (!%p293_p0)
}
  0x4d   :  { %s297_s23 = scalar_lea.hbm %s389_s3, 256 }
  0x4e   :  { %p298_p1 = scmp.ne.s32.totalorder %s389_s3, %s297_s23  ;;  %p301_p2 = scmp.lt.u32.totalorder %s297_s23, %s389_s3 }
  0x50   :  { %p303_p3 = pnand %p301_p2, %p298_p1 }
  0x52   :  { %306 = shalt.err (!%p303_p3)
}
  0x53   :  { %207 = dma.vmem_to_hbm [thread:$0]  %s205_s19, 256, %s389_s3, [#allocation4]  }
  0x54   :  { %311 = dma.done.wait [#allocation4], 256  }
  0x55   :  { %312 = vsyncadd [#allocation4], 4294967040 }
  0x56   :  { %211 = vsyncpa [#allocation3], 1 }
  0x57   :  { %212 = vsyncpa [#allocation6], 1 }
  0x58   :  { %213 = vsyncpa [#allocation4], 1 }

</bundles_post_ra>
